<compile_context>
chip_gen: v6e
topology: v6e:2x2x1
jax: 0.10.0
libtpu: 0.0.40
codegen_flags: <defaults>
</compile_context>

<pallas_src>
import functools

import jax
import jax.numpy as jnp
from jax.experimental import pallas as pl
from jax.experimental.pallas import tpu as pltpu

EPS = 1e-5
LANE = 128


# ---------------------------------------------------------------------------
# Kernel 1: per-lane sum and sum-of-squares reduction over row tiles.
# Accumulators are (8, lane) so the per-tile work stays on the VPU; the
# cross-sublane reduction happens once, outside the kernel.
# ---------------------------------------------------------------------------
def _stats_kernel(x_ref, sum_ref, sumsq_ref, sum_acc, sumsq_acc, *, block_rows):
    i = pl.program_id(0)

    @pl.when(i == 0)
    def _():
        sum_acc[...] = jnp.zeros_like(sum_acc)
        sumsq_acc[...] = jnp.zeros_like(sumsq_acc)

    x = x_ref[...].astype(jnp.float32)
    lane = x.shape[-1]
    if block_rows % 8 == 0:
        xs = x.reshape(block_rows // 8, 8, lane)
        sum_acc[...] += jnp.sum(xs, axis=0)
        sumsq_acc[...] += jnp.sum(xs * xs, axis=0)
    else:
        # Small (single-tile) fallback: full reduce into sublane 0.
        part = jnp.sum(x, axis=0, keepdims=True)
        partsq = jnp.sum(x * x, axis=0, keepdims=True)
        sum_acc[0:1, :] = sum_acc[0:1, :] + part
        sumsq_acc[0:1, :] = sumsq_acc[0:1, :] + partsq

    @pl.when(i == pl.num_programs(0) - 1)
    def _():
        sum_ref[...] = sum_acc[...]
        sumsq_ref[...] = sumsq_acc[...]


# ---------------------------------------------------------------------------
# Kernel 2: y = x * scale + shift  (scale/shift precomputed per lane).
# ---------------------------------------------------------------------------
def _normalize_kernel(x_ref, scale_ref, shift_ref, o_ref):
    x = x_ref[...].astype(jnp.float32)
    o_ref[...] = (x * scale_ref[...] + shift_ref[...]).astype(o_ref.dtype)


def batch_norm_seq(x, gamma, beta):
    """x: (B, L, C) channels-last. Returns BatchNorm1d-over-C applied to x."""
    B, L, C = x.shape
    N = B * L

    # ---- lane folding: pack `fold` consecutive rows into the 128-wide lanes.
    if C < LANE and LANE % C == 0:
        fold = LANE // C
        while fold > 1 and N % fold != 0:
            fold //= 2
    else:
        fold = 1
    c_lane = C * fold
    n_rows = N // fold

    xf = x.reshape(N, C).reshape(n_rows, c_lane)

    # ---- row tile: ~2 MiB per input tile, multiple of 8 sublanes.
    bytes_per_row = c_lane * 4
    target_rows = max(8, min(1024, (2 << 20) // bytes_per_row))
    target_rows = (target_rows // 8) * 8
    if n_rows <= target_rows:
        row_tile = n_rows            # single full-extent tile (no 8-div needed)
        n_pad = n_rows
    else:
        row_tile = target_rows
        n_pad = ((n_rows + row_tile - 1) // row_tile) * row_tile

    if n_pad != n_rows:
        # Zero rows contribute nothing to the sums; count uses the true N.
        xf = jnp.pad(xf, ((0, n_pad - n_rows), (0, 0)))

    grid = (n_pad // row_tile,)

    # --- pass 1: per-lane sums / sums-of-squares ------------------------
    stats_fn = functools.partial(_stats_kernel, block_rows=row_tile)
    sums8, sumsq8 = pl.pallas_call(
        stats_fn,
        out_shape=(jax.ShapeDtypeStruct((8, c_lane), jnp.float32),
                   jax.ShapeDtypeStruct((8, c_lane), jnp.float32)),
        grid_spec=pltpu.PrefetchScalarGridSpec(
            num_scalar_prefetch=0,
            grid=grid,
            in_specs=[pl.BlockSpec((row_tile, c_lane), lambda i: (i, 0))],
            out_specs=[pl.BlockSpec((8, c_lane), lambda i: (0, 0)),
                       pl.BlockSpec((8, c_lane), lambda i: (0, 0))],
            scratch_shapes=[pltpu.VMEM((8, c_lane), jnp.float32),
                            pltpu.VMEM((8, c_lane), jnp.float32)],
        ),
        compiler_params=pltpu.CompilerParams(
            dimension_semantics=("arbitrary",)),
    )(xf)

    # --- tiny per-channel math (done once, outside the hot loops) -------
    count = float(N)
    sum_c = sums8.reshape(8, fold, C).sum(axis=(0, 1))
    sumsq_c = sumsq8.reshape(8, fold, C).sum(axis=(0, 1))
    mean = sum_c / count
    var = jnp.maximum(sumsq_c / count - mean * mean, 0.0)   # biased, clamped
    scale_c = gamma.astype(jnp.float32) * jax.lax.rsqrt(var + EPS)
    shift_c = beta.astype(jnp.float32) - mean * scale_c
    scale = jnp.tile(scale_c, fold).reshape(1, c_lane)
    shift = jnp.tile(shift_c, fold).reshape(1, c_lane)

    # --- pass 2: y = x * scale + shift -----------------------------------
    yf = pl.pallas_call(
        _normalize_kernel,
        out_shape=jax.ShapeDtypeStruct((n_pad, c_lane), x.dtype),
        grid_spec=pltpu.PrefetchScalarGridSpec(
            num_scalar_prefetch=0,
            grid=grid,
            in_specs=[pl.BlockSpec((row_tile, c_lane), lambda i: (i, 0)),
                      pl.BlockSpec((1, c_lane), lambda i: (0, 0)),
                      pl.BlockSpec((1, c_lane), lambda i: (0, 0))],
            out_specs=pl.BlockSpec((row_tile, c_lane), lambda i: (i, 0)),
        ),
        compiler_params=pltpu.CompilerParams(
            dimension_semantics=("parallel",)),
    )(xf, scale, shift)

    return yf[:n_rows].reshape(N, C).reshape(B, L, C)


def batch_norm_seq_ref(x, gamma, beta):
    """Pure-JAX reference matching PyTorch BatchNorm1d training forward."""
    xf = x.astype(jnp.float32)
    mean = jnp.mean(xf, axis=(0, 1), keepdims=True)
    var = jnp.mean((xf - mean) ** 2, axis=(0, 1), keepdims=True)  # biased
    y = (xf - mean) / jnp.sqrt(var + EPS) * gamma + beta
    return y.astype(x.dtype)


if __name__ == "__main__":
    B, L, C = 2, 8, 32  # x: (batch, seq, dim); BatchNorm(dim=32)
    key = jax.random.PRNGKey(0)
    kx, kg, kb = jax.random.split(key, 3)
    x = jax.random.normal(kx, (B, L, C), dtype=jnp.float32)

    # nn.BatchNorm1d parameters (perturbed from the ones/zeros init so the
    # affine path is actually exercised).
    gamma = 1.0 + 0.1 * jax.random.normal(kg, (C,), dtype=jnp.float32)
    beta = 0.1 * jax.random.normal(kb, (C,), dtype=jnp.float32)

    y = batch_norm_seq(x, gamma, beta)
    y = jax.block_until_ready(y)

    y_ref = batch_norm_seq_ref(x, gamma, beta)
    assert y.shape == (B, L, C)
    assert jnp.allclose(y, y_ref, atol=1e-5, rtol=1e-5), "mismatch vs reference"

    print("KERNEL_OK")
</pallas_src>

<mosaic_0001>
module attributes {stable_mosaic.version = 11 : i64} {
  func.func @_stats_kernel(%arg0: i32, %arg1: memref<4x128xf32, #tpu.memory_space<vmem>>, %arg2: memref<8x128xf32, #tpu.memory_space<vmem>>, %arg3: memref<8x128xf32, #tpu.memory_space<vmem>>, %arg4: memref<8x128xf32, #tpu.memory_space<vmem>>, %arg5: memref<8x128xf32, #tpu.memory_space<vmem>>) attributes {dimension_semantics = [#tpu.dimension_semantics<arbitrary>], iteration_bounds = array<i64: 1>, scalar_prefetch = 0 : i64, scratch_operands = 2 : i64, tpu.core_type = #tpu.core_type<tc>, window_params = [{transform_indices = @transform_0, window_bounds = array<i64: 4, 128>}, {pipeline_mode = #tpu.pipeline_mode<synchronous>, transform_indices = @transform_1, window_bounds = array<i64: 8, 128>}, {pipeline_mode = #tpu.pipeline_mode<synchronous>, transform_indices = @transform_2, window_bounds = array<i64: 8, 128>}]} {
    %c0_i32 = arith.constant 0 : i32
    %0 = arith.cmpi eq, %arg0, %c0_i32 : i32
    %1 = arith.extui %0 : i1 to i32
    %c0_i32_0 = arith.constant 0 : i32
    %2 = arith.cmpi ne, %1, %c0_i32_0 : i32
    scf.if %2 {
      %cst_13 = arith.constant 0.000000e+00 : f32
      %18 = vector.broadcast %cst_13 : f32 to vector<8x128xf32>
      %c0_14 = arith.constant 0 : index
      %c0_15 = arith.constant 0 : index
      %19 = vector.load %arg4[%c0_14, %c0_15] : memref<8x128xf32, #tpu.memory_space<vmem>>, vector<8x128xf32>
      tpu.vector_store %arg4[%c0_14, %c0_15], %18 {strides = array<i32>} : memref<8x128xf32, #tpu.memory_space<vmem>>, vector<8x128xf32>,
      %cst_16 = arith.constant 0.000000e+00 : f32
      %20 = vector.broadcast %cst_16 : f32 to vector<8x128xf32>
      %c0_17 = arith.constant 0 : index
      %c0_18 = arith.constant 0 : index
      %21 = vector.load %arg5[%c0_17, %c0_18] : memref<8x128xf32, #tpu.memory_space<vmem>>, vector<8x128xf32>
      tpu.vector_store %arg5[%c0_17, %c0_18], %20 {strides = array<i32>} : memref<8x128xf32, #tpu.memory_space<vmem>>, vector<8x128xf32>,
    } else {
    }
    %c0 = arith.constant 0 : index
    %c0_1 = arith.constant 0 : index
    %3 = vector.load %arg1[%c0, %c0_1] : memref<4x128xf32, #tpu.memory_space<vmem>>, vector<4x128xf32>
    %cst = arith.constant dense<0.000000e+00> : vector<128xf32>
    %4 = vector.multi_reduction <add>, %3, %cst [0] : vector<4x128xf32> to vector<128xf32>
    %5 = vector.shape_cast %4 : vector<128xf32> to vector<1x128xf32>
    %6 = arith.mulf %3, %3 : vector<4x128xf32>
    %cst_2 = arith.constant dense<0.000000e+00> : vector<128xf32>
    %7 = vector.multi_reduction <add>, %6, %cst_2 [0] : vector<4x128xf32> to vector<128xf32>
    %8 = vector.shape_cast %7 : vector<128xf32> to vector<1x128xf32>
    %c0_3 = arith.constant 0 : index
    %c0_4 = arith.constant 0 : index
    %9 = vector.load %arg4[%c0_3, %c0_4] : memref<8x128xf32, #tpu.memory_space<vmem>>, vector<1x128xf32>
    %10 = arith.addf %9, %5 : vector<1x128xf32>
    %c0_5 = arith.constant 0 : index
    %c0_6 = arith.constant 0 : index
    %11 = vector.load %arg4[%c0_5, %c0_6] : memref<8x128xf32, #tpu.memory_space<vmem>>, vector<1x128xf32>
    tpu.vector_store %arg4[%c0_5, %c0_6], %10 {strides = array<i32>} : memref<8x128xf32, #tpu.memory_space<vmem>>, vector<1x128xf32>,
    %c0_7 = arith.constant 0 : index
    %c0_8 = arith.constant 0 : index
    %12 = vector.load %arg5[%c0_7, %c0_8] : memref<8x128xf32, #tpu.memory_space<vmem>>, vector<1x128xf32>
    %13 = arith.addf %12, %8 : vector<1x128xf32>
    %c0_9 = arith.constant 0 : index
    %c0_10 = arith.constant 0 : index
    %14 = vector.load %arg5[%c0_9, %c0_10] : memref<8x128xf32, #tpu.memory_space<vmem>>, vector<1x128xf32>
    tpu.vector_store %arg5[%c0_9, %c0_10], %13 {strides = array<i32>} : memref<8x128xf32, #tpu.memory_space<vmem>>, vector<1x128xf32>,
    %c0_i32_11 = arith.constant 0 : i32
    %15 = arith.cmpi eq, %arg0, %c0_i32_11 : i32
    %16 = arith.extui %15 : i1 to i32
    %c0_i32_12 = arith.constant 0 : i32
    %17 = arith.cmpi ne, %16, %c0_i32_12 : i32
    scf.if %17 {
      %c0_13 = arith.constant 0 : index
      %c0_14 = arith.constant 0 : index
      %18 = vector.load %arg4[%c0_13, %c0_14] : memref<8x128xf32, #tpu.memory_space<vmem>>, vector<8x128xf32>
      %c0_15 = arith.constant 0 : index
      %c0_16 = arith.constant 0 : index
      %19 = vector.load %arg2[%c0_15, %c0_16] : memref<8x128xf32, #tpu.memory_space<vmem>>, vector<8x128xf32>
      tpu.vector_store %arg2[%c0_15, %c0_16], %18 {strides = array<i32>} : memref<8x128xf32, #tpu.memory_space<vmem>>, vector<8x128xf32>,
      %c0_17 = arith.constant 0 : index
      %c0_18 = arith.constant 0 : index
      %20 = vector.load %arg5[%c0_17, %c0_18] : memref<8x128xf32, #tpu.memory_space<vmem>>, vector<8x128xf32>
      %c0_19 = arith.constant 0 : index
      %c0_20 = arith.constant 0 : index
      %21 = vector.load %arg3[%c0_19, %c0_20] : memref<8x128xf32, #tpu.memory_space<vmem>>, vector<8x128xf32>
      tpu.vector_store %arg3[%c0_19, %c0_20], %20 {strides = array<i32>} : memref<8x128xf32, #tpu.memory_space<vmem>>, vector<8x128xf32>,
    } else {
    }
    return
  }
  func.func @transform_0(%arg0: i32) -> (i32, i32) {
    %c0_i32 = arith.constant 0 : i32
    %c0_i32_0 = arith.constant 0 : i32
    return %arg0, %c0_i32 : i32, i32
  }
  func.func @transform_1(%arg0: i32) -> (i32, i32) {
    %c0_i32 = arith.constant 0 : i32
    %c0_i32_0 = arith.constant 0 : i32
    %c0_i32_1 = arith.constant 0 : i32
    return %c0_i32, %c0_i32_0 : i32, i32
  }
  func.func @transform_2(%arg0: i32) -> (i32, i32) {
    %c0_i32 = arith.constant 0 : i32
    %c0_i32_0 = arith.constant 0 : i32
    %c0_i32_1 = arith.constant 0 : i32
    return %c0_i32, %c0_i32_0 : i32, i32
  }
}

</mosaic_0001>

<bundles_post_ra>
// kernel: tpu_custom_call.1
= control target key start
LH: loop header
LB: loop body
LE: loop exit
PB: predicated region body
PF: predicated region fallthrough
CT: control target
= control target key end

     0   :  { %8 = vsyncpa [#allocation5], 0  ;;  %s187_s0 = inlined_call_operand.hbm [shape: f32[4,128], index: 0, kind: input, shape index: {}]   ;;  %s188_s1 = inlined_call_operand.hbm [shape: f32[8,128], index: 1, kind: output, shape index: {0}]   ;;  %s189_s2 = inlined_call_operand.hbm [shape: f32[8,128], index: 2, kind: output, shape index: {1}]  }
   0x1   :  { %9 = vsyncpa [#allocation6], 0 }
   0x2   :  { %10 = vsyncpa [#allocation9], 0  ;;  %s159_s9 = smov [#allocation4]  }
   0x3   :  { %s17_s10 = sshll.u32 %s159_s9, 4  ;;  %s18_s10 = int_to_ptr.vmem [resolvable:$true] %s17_s10 }
   0x4   :  { %s101_s11 = scalar_lea.vmem %s18_s10, 64  ;;  %p106_p1 = scmp.lt.s32.totalorder %s18_s10, %s18_s10 }
   0x5   :  { %p102_p0 = scmp.ne.s32.totalorder %s18_s10, %s101_s11  ;;  %p107_p2 = scmp.lt.s32.totalorder %s101_s11, %s101_s11 }
   0x7   :  { %p108_p3 = por %p107_p2, %p106_p1 }
   0x9   :  { %p109_p4 = pnand %p108_p3, %p102_p0 }
   0xb   :  { %112 = shalt.err (!%p109_p4)
}
   0xc   :  { %20 = dma.hbm_to_vmem [thread:$0]  %s187_s0, 64, %s18_s10, [#allocation5]  }
   0xd   :  { %153 = dma.done.wait [#allocation5], 64  }
   0xe   :  { %154 = vsyncadd [#allocation5], 4294967232  ;;  %v160_v0 = vmov 0.0   ;;  %vm31_vm0 = vcmask 1043456   ;;  %v30_v1 = vld [vmem:[#allocation4] sm:$0xf] }
   0xf   :  { %28 = vst [vmem:[#allocation2] sm:$0xff] %v160_v0  ;;  %29 = vst [vmem:[#allocation3] sm:$0xff] %v160_v0  ;;  %v32_v2 = vsel %vm31_vm0, %v30_v1, 0.0  ;;  %v39_v3 = vmul.f32 %v30_v1, %v30_v1  ;;  %s161_s0 = smov [#allocation7]   ;;  %s162_s15 = smov [#allocation8]  }
  0x10   :  { %v33_v4 = vrot.slane %v32_v2, 4  ;;  %s66_s14 = sshll.u32 %s161_s0, 4  ;;  %s76_s16 = sshll.u32 %s162_s15, 4  ;;  %s67_s14 = int_to_ptr.vmem [resolvable:$true] %s66_s14  ;;  %s77_s16 = int_to_ptr.vmem [resolvable:$true] %s76_s16 }
  0x11   :  { %v40_v5 = vsel %vm31_vm0, %v39_v3, 0.0  ;;  %s113_s17 = scalar_lea.vmem %s67_s14, 128  ;;  %p118_p6 = scmp.lt.s32.totalorder %s67_s14, %s67_s14 }
  0x12   :  { %v34_v6 = vadd.f32 %v33_v4, %v32_v2  ;;  %v41_v7 = vrot.slane %v40_v5, 4  ;;  %p114_p5 = scmp.ne.s32.totalorder %s67_s14, %s113_s17  ;;  %p119_p7 = scmp.lt.s32.totalorder %s113_s17, %s113_s17 }
  0x14   :  { %v35_v8 = vrot.slane %v34_v6, 2  ;;  %v42_v9 = vadd.f32 %v41_v7, %v40_v5  ;;  %p120_p8 = por %p119_p7, %p118_p6 }
  0x16   :  { %v36_v10 = vadd.f32 %v35_v8, %v34_v6  ;;  %v43_v11 = vrot.slane %v42_v9, 2  ;;  %v47_v14 = vld [vmem:[#allocation2] sm:$0x1]  ;;  %v50_v17 = vld [vmem:[#allocation3] sm:$0x1]  ;;  %p121_p9 = pnand %p120_p8, %p114_p5 }
  0x18   :  { %v37_v12 = vrot.slane %v36_v10, 1  ;;  %v44_v13 = vadd.f32 %v43_v11, %v42_v9 }
  0x1a   :  { %v38_v15 = vadd.f32 %v37_v12, %v36_v10  ;;  %v45_v16 = vrot.slane %v44_v13, 1 }
  0x1c   :  { %v48_v18 = vadd.f32 %v47_v14, %v38_v15  ;;  %v46_v19 = vadd.f32 %v45_v16, %v44_v13 }
  0x1e   :  { %49 = vst [vmem:[#allocation2] sm:$0x1] %v48_v18  ;;  %v51_v20 = vadd.f32 %v50_v17, %v46_v19 }
  0x20   :  { %52 = vst [vmem:[#allocation3] sm:$0x1] %v51_v20 }
  0x25   :  { %v56_v21 = vld [vmem:[#allocation2] sm:$0xff] }
  0x26   :  { %57 = vst [vmem:[#allocation7] sm:$0xff] %v56_v21 }
  0x27   :  { %v58_v22 = vld [vmem:[#allocation3] sm:$0xff] }
  0x28   :  { %124 = shalt.err (!%p121_p9)
}
  0x29   :  { %69 = dma.vmem_to_hbm [thread:$0]  %s67_s14, 128, %s188_s1, [#allocation6]   ;;  %59 = vst [vmem:[#allocation8] sm:$0xff] %v58_v22 }
  0x2a   :  { %s133_s20 = scalar_lea.vmem %s77_s16, 128  ;;  %p138_p11 = scmp.lt.s32.totalorder %s77_s16, %s77_s16 }
  0x2b   :  { %p134_p10 = scmp.ne.s32.totalorder %s77_s16, %s133_s20  ;;  %p139_p12 = scmp.lt.s32.totalorder %s133_s20, %s133_s20 }
  0x2d   :  { %p140_p13 = por %p139_p12, %p138_p11 }
  0x2f   :  { %p141_p0 = pnand %p140_p13, %p134_p10 }
  0x31   :  { %144 = shalt.err (!%p141_p0)
}
  0x32   :  { %79 = dma.vmem_to_hbm [thread:$0]  %s77_s16, 128, %s189_s2, [#allocation9]  }
  0x33   :  { %155 = dma.done.wait [#allocation6], 128  }
  0x34   :  { %156 = vsyncadd [#allocation6], 4294967168 }
  0x35   :  { %157 = dma.done.wait [#allocation9], 128  }
  0x36   :  { %158 = vsyncadd [#allocation9], 4294967168 }
  0x37   :  { %86 = vsyncpa [#allocation5], 1 }
  0x38   :  { %87 = vsyncpa [#allocation6], 1 }
  0x39   :  { %88 = vsyncpa [#allocation9], 1 }

</bundles_post_ra>
